<compile_context>
chip_gen: v6e
topology: v6e:2x2x1
jax: 0.10.0
libtpu: 0.0.40
codegen_flags: <defaults>
</compile_context>

<pallas_src>
import jax
import jax.numpy as jnp
from jax.experimental import pallas as pl
from jax.experimental.pallas import tpu as pltpu


def _round_up(n, m):
    return ((n + m - 1) // m) * m


def q_mlp_kernel(xt_ref, w1t_ref, w2t_ref, b2_ref, w3t_ref, b3_ref, o_ref):
    """One batch tile (batch on lanes) of the fused 3-layer MLP.

    xt_ref  : (D+1, TB) bf16  feature-major input tile; last row = ones (folds b1)
    w1t_ref : (128, D+1) bf16 W1^T with b1 appended as the last column
    w2t_ref : (64, 128)  bf16 W2^T
    b2_ref  : (64, 1)    f32
    w3t_ref : (8, 64)    bf16 row 0 = W3^T, rows 1..7 zero padding
    b3_ref  : (1, 1)     f32
    o_ref   : (1, TB)    f32  lane-dense output slab (batch on lanes)
    """
    # Layer 1 (bias already folded into the matmul via the ones row of xT).
    h1t = jnp.dot(w1t_ref[...], xt_ref[...], preferred_element_type=jnp.float32)   # (128, TB)
    h1t = jnp.maximum(h1t, 0.0).astype(jnp.bfloat16)

    # Layer 2: bias + ReLU + bf16 downcast fused into one epilogue expression.
    h2t = jnp.dot(w2t_ref[...], h1t, preferred_element_type=jnp.float32)           # (64, TB)
    h2t = jnp.maximum(h2t + b2_ref[...], 0.0).astype(jnp.bfloat16)

    # Layer 3: (8,64) @ (64,TB) -> (8,TB); only row 0 of the LHS is real.  MXU-native
    # contraction (no transposed-operand dot_general), result already lane-dense.
    out_t = jnp.dot(w3t_ref[...], h2t, preferred_element_type=jnp.float32)         # (8, TB)
    o_ref[...] = (out_t[0:1, :] + b3_ref[...]).astype(o_ref.dtype)


def reference_forward(x, p):
    h1 = jnp.maximum(x @ p["w1"] + p["b1"], 0.0)
    h2 = jnp.maximum(h1 @ p["w2"] + p["b2"], 0.0)
    return h2 @ p["w3"] + p["b3"]


def q_forward(x, params, *, max_block_batch=4096, min_pallas_batch=256):
    """Run the fused Q-network MLP as a Pallas kernel.

    x: (B, state_dim + action_dim) float32
    params: dict with w1 (D,128), b1 (1,128), w2 (128,64), b2 (1,64),
            w3 (64,1), b3 (1,1)  -- all float32, same math as the PyTorch module.
    returns: (B, 1) float32  (same as PyTorch `self.model(state)`)
    """
    x = jnp.asarray(x, jnp.float32)
    B, D = x.shape

    # Tiny-batch bypass: pallas launch + pad-to-128 overhead dominates; XLA fuses this fine.
    if B < min_pallas_batch:
        return reference_forward(x, params)

    # Batch tile: multiple of 128 (lane-dense), capped by max_block_batch, and split into
    # at least two tiles so both v7x TensorCores get work on the "parallel" batch axis.
    B128 = _round_up(B, 128)
    TB = min(max_block_batch, B128)
    if TB == B128 and B128 >= 256:
        TB = _round_up(B128 // 2, 128)
    B_pad = _round_up(B, TB)
    num_tiles = B_pad // TB

    # Feature-major augmented input: (D+1, B_pad) bf16, last row = ones (folds b1 into W1).
    xt = jnp.concatenate([x, jnp.ones((B, 1), jnp.float32)], axis=1)
    if B_pad != B:
        xt = jnp.pad(xt, ((0, B_pad - B), (0, 0)))
    xt = xt.T.astype(jnp.bfloat16)                                               # (D+1, B_pad)

    # Weights transposed to feature-major, bf16 MXU operands (f32 accumulation in-kernel).
    w1t = jnp.concatenate([params["w1"].T, params["b1"].reshape(-1, 1)],
                          axis=1).astype(jnp.bfloat16)                           # (128, D+1)
    w2t = params["w2"].T.astype(jnp.bfloat16)                                    # (64, 128)
    b2 = params["b2"].reshape(-1, 1).astype(jnp.float32)                         # (64, 1)
    w3t = jnp.pad(params["w3"].T, ((0, 7), (0, 0))).astype(jnp.bfloat16)         # (8, 64)
    b3 = params["b3"].reshape(1, 1).astype(jnp.float32)                          # (1, 1)

    const = lambda arr: pl.BlockSpec(arr.shape, lambda i: (0, 0))

    flops = 2 * B_pad * ((D + 1) * 128 + 128 * 64 + 64 * 8)
    bytes_accessed = (xt.size * 2 + B_pad * 4
                      + (w1t.size + w2t.size + w3t.size) * 2
                      + (b2.size + b3.size) * 4)

    out = pl.pallas_call(
        q_mlp_kernel,
        out_shape=jax.ShapeDtypeStruct((1, B_pad), jnp.float32),
        grid_spec=pltpu.PrefetchScalarGridSpec(
            num_scalar_prefetch=0,
            grid=(num_tiles,),
            in_specs=[
                pl.BlockSpec((D + 1, TB), lambda i: (0, i)),   # xT: tiled over batch lanes
                const(w1t), const(w2t), const(b2),             # weights/biases VMEM-resident
                const(w3t), const(b3),
            ],
            out_specs=pl.BlockSpec((1, TB), lambda i: (0, i)),  # lane-dense output slab
        ),
        compiler_params=pltpu.CompilerParams(
            dimension_semantics=("parallel",)),
        cost_estimate=pl.CostEstimate(
            flops=flops, transcendentals=0, bytes_accessed=bytes_accessed),
    )(xt, w1t, w2t, b2, w3t, b3)

    # (1, B_pad) -> (B, 1): free row-major reshape, then drop the batch padding.
    return out.reshape(B_pad, 1)[:B]


def init_params(key, in_dim):
    """Deterministic init mimicking nn.Linear's uniform(-1/sqrt(fan_in), ...)."""
    dims = [(in_dim, 128), (128, 64), (64, 1)]
    params = {}
    for i, (fan_in, fan_out) in enumerate(dims, start=1):
        key, kw, kb = jax.random.split(key, 3)
        bound = 1.0 / jnp.sqrt(jnp.float32(fan_in))
        params[f"w{i}"] = jax.random.uniform(
            kw, (fan_in, fan_out), jnp.float32, -bound, bound)
        params[f"b{i}"] = jax.random.uniform(
            kb, (1, fan_out), jnp.float32, -bound, bound)
    return params


# TODO(synk): training pieces of the PyTorch module (MSELoss, Adam, fit()) are host-side
# training-loop code and out of scope for this forward-pass kernel.

if __name__ == "__main__":
    state_dim, action_dim = 6, 2
    in_dim = state_dim + action_dim

    key = jax.random.PRNGKey(0)
    key, kx_big, kx_small = jax.random.split(key, 3)
    params = init_params(key, in_dim)

    # Pallas path: 512 rows -> two 256-wide lane tiles on the "parallel" grid axis.
    x_big = jax.random.normal(kx_big, (512, in_dim), jnp.float32)
    out_big = jax.block_until_ready(q_forward(x_big, params))
    ref_big = reference_forward(x_big, params)
    assert out_big.shape == (512, 1)
    # bf16 MXU operands with f32 accumulation -> compare at bf16-level tolerance.
    assert jnp.allclose(out_big, ref_big, atol=5e-2, rtol=5e-2), \
        float(jnp.max(jnp.abs(out_big - ref_big)))

    # Tiny-batch bypass path (plain jnp; pallas launch overhead would dominate here).
    x_small = jax.random.normal(kx_small, (8, in_dim), jnp.float32)
    out_small = jax.block_until_ready(q_forward(x_small, params))
    ref_small = reference_forward(x_small, params)
    assert out_small.shape == (8, 1)
    assert jnp.allclose(out_small, ref_small, atol=1e-5, rtol=1e-5)

    print("KERNEL_OK")
</pallas_src>

<mosaic_0001>
module attributes {stable_mosaic.version = 11 : i64} {
  func.func @q_mlp_kernel(%arg0: i32, %arg1: memref<9x256xbf16, #tpu.memory_space<vmem>>, %arg2: memref<128x9xbf16, #tpu.memory_space<vmem>>, %arg3: memref<64x128xbf16, #tpu.memory_space<vmem>>, %arg4: memref<64x1xf32, #tpu.memory_space<vmem>>, %arg5: memref<8x64xbf16, #tpu.memory_space<vmem>>, %arg6: memref<1x1xf32, #tpu.memory_space<vmem>>, %arg7: memref<1x256xf32, #tpu.memory_space<vmem>>) attributes {dimension_semantics = [#tpu.dimension_semantics<parallel>], iteration_bounds = array<i64: 2>, scalar_prefetch = 0 : i64, scratch_operands = 0 : i64, tpu.core_type = #tpu.core_type<tc>, window_params = [{transform_indices = @transform_0, window_bounds = array<i64: 9, 256>}, {pipeline_mode = #tpu.pipeline_mode<synchronous>, transform_indices = @transform_1, window_bounds = array<i64: 128, 9>}, {pipeline_mode = #tpu.pipeline_mode<synchronous>, transform_indices = @transform_2, window_bounds = array<i64: 64, 128>}, {pipeline_mode = #tpu.pipeline_mode<synchronous>, transform_indices = @transform_3, window_bounds = array<i64: 64, 1>}, {pipeline_mode = #tpu.pipeline_mode<synchronous>, transform_indices = @transform_4, window_bounds = array<i64: 8, 64>}, {pipeline_mode = #tpu.pipeline_mode<synchronous>, transform_indices = @transform_5, window_bounds = array<i64: 1, 1>}, {transform_indices = @transform_6, window_bounds = array<i64: 1, 256>}]} {
    %c0 = arith.constant 0 : index
    %c0_0 = arith.constant 0 : index
    %0 = vector.load %arg2[%c0, %c0_0] : memref<128x9xbf16, #tpu.memory_space<vmem>>, vector<128x9xbf16>
    %c0_1 = arith.constant 0 : index
    %c0_2 = arith.constant 0 : index
    %1 = vector.load %arg1[%c0_1, %c0_2] : memref<9x256xbf16, #tpu.memory_space<vmem>>, vector<9x256xbf16>
    %cst = arith.constant dense<0.000000e+00> : vector<128x256xf32>
    %2 = tpu.matmul %0, %1, %cst {dimension_numbers = #tpu.dot_dimension_numbers<[1], [0], [0], [1], [0, 0, 1, 1], [], []>} : vector<128x9xbf16>, vector<9x256xbf16>, vector<128x256xf32> -> vector<128x256xf32>
    %cst_3 = arith.constant 0.000000e+00 : f32
    %3 = vector.broadcast %cst_3 : f32 to vector<128x256xf32>
    %4 = arith.maximumf %2, %3 : vector<128x256xf32>
    %5 = arith.truncf %4 : vector<128x256xf32> to vector<128x256xbf16>
    %c0_4 = arith.constant 0 : index
    %c0_5 = arith.constant 0 : index
    %6 = vector.load %arg3[%c0_4, %c0_5] : memref<64x128xbf16, #tpu.memory_space<vmem>>, vector<64x128xbf16>
    %cst_6 = arith.constant dense<0.000000e+00> : vector<64x256xf32>
    %7 = tpu.matmul %6, %5, %cst_6 {dimension_numbers = #tpu.dot_dimension_numbers<[1], [0], [0], [1], [0, 0, 1, 1], [], []>} : vector<64x128xbf16>, vector<128x256xbf16>, vector<64x256xf32> -> vector<64x256xf32>
    %c0_7 = arith.constant 0 : index
    %c0_8 = arith.constant 0 : index
    %8 = vector.load %arg4[%c0_7, %c0_8] : memref<64x1xf32, #tpu.memory_space<vmem>>, vector<64x1xf32>
    %9 = vector.broadcast %8 : vector<64x1xf32> to vector<64x256xf32>
    %10 = arith.addf %7, %9 : vector<64x256xf32>
    %cst_9 = arith.constant 0.000000e+00 : f32
    %11 = vector.broadcast %cst_9 : f32 to vector<64x256xf32>
    %12 = arith.maximumf %10, %11 : vector<64x256xf32>
    %13 = arith.truncf %12 : vector<64x256xf32> to vector<64x256xbf16>
    %c0_10 = arith.constant 0 : index
    %c0_11 = arith.constant 0 : index
    %14 = vector.load %arg5[%c0_10, %c0_11] : memref<8x64xbf16, #tpu.memory_space<vmem>>, vector<8x64xbf16>
    %cst_12 = arith.constant dense<0.000000e+00> : vector<8x256xf32>
    %15 = tpu.matmul %14, %13, %cst_12 {dimension_numbers = #tpu.dot_dimension_numbers<[1], [0], [0], [1], [0, 0, 1, 1], [], []>} : vector<8x64xbf16>, vector<64x256xbf16>, vector<8x256xf32> -> vector<8x256xf32>
    %16 = vector.extract_strided_slice %15 {offsets = [0, 0], sizes = [1, 256], strides = [1, 1]} : vector<8x256xf32> to vector<1x256xf32>
    %c0_13 = arith.constant 0 : index
    %c0_14 = arith.constant 0 : index
    %17 = vector.load %arg6[%c0_13, %c0_14] : memref<1x1xf32, #tpu.memory_space<vmem>>, vector<1x1xf32>
    %18 = vector.broadcast %17 : vector<1x1xf32> to vector<1x256xf32>
    %19 = arith.addf %16, %18 : vector<1x256xf32>
    %c0_15 = arith.constant 0 : index
    %c0_16 = arith.constant 0 : index
    %20 = vector.load %arg7[%c0_15, %c0_16] : memref<1x256xf32, #tpu.memory_space<vmem>>, vector<1x256xf32>
    tpu.vector_store %arg7[%c0_15, %c0_16], %19 {strides = array<i32>} : memref<1x256xf32, #tpu.memory_space<vmem>>, vector<1x256xf32>,
    return
  }
  func.func @transform_0(%arg0: i32) -> (i32, i32) {
    %c0_i32 = arith.constant 0 : i32
    %c0_i32_0 = arith.constant 0 : i32
    return %c0_i32, %arg0 : i32, i32
  }
  func.func @transform_1(%arg0: i32) -> (i32, i32) {
    %c0_i32 = arith.constant 0 : i32
    %c0_i32_0 = arith.constant 0 : i32
    %c0_i32_1 = arith.constant 0 : i32
    return %c0_i32, %c0_i32_0 : i32, i32
  }
  func.func @transform_2(%arg0: i32) -> (i32, i32) {
    %c0_i32 = arith.constant 0 : i32
    %c0_i32_0 = arith.constant 0 : i32
    %c0_i32_1 = arith.constant 0 : i32
    return %c0_i32, %c0_i32_0 : i32, i32
  }
  func.func @transform_3(%arg0: i32) -> (i32, i32) {
    %c0_i32 = arith.constant 0 : i32
    %c0_i32_0 = arith.constant 0 : i32
    %c0_i32_1 = arith.constant 0 : i32
    return %c0_i32, %c0_i32_0 : i32, i32
  }
  func.func @transform_4(%arg0: i32) -> (i32, i32) {
    %c0_i32 = arith.constant 0 : i32
    %c0_i32_0 = arith.constant 0 : i32
    %c0_i32_1 = arith.constant 0 : i32
    return %c0_i32, %c0_i32_0 : i32, i32
  }
  func.func @transform_5(%arg0: i32) -> (i32, i32) {
    %c0_i32 = arith.constant 0 : i32
    %c0_i32_0 = arith.constant 0 : i32
    %c0_i32_1 = arith.constant 0 : i32
    return %c0_i32, %c0_i32_0 : i32, i32
  }
  func.func @transform_6(%arg0: i32) -> (i32, i32) {
    %c0_i32 = arith.constant 0 : i32
    %c0_i32_0 = arith.constant 0 : i32
    return %c0_i32, %arg0 : i32, i32
  }
}

</mosaic_0001>

<bundles_post_ra>
// kernel: tpu_custom_call.1
= control target key start
LH: loop header
LB: loop body
LE: loop exit
PB: predicated region body
PF: predicated region fallthrough
CT: control target
= control target key end

     0   :  { %s1304_s0 = inlined_call_operand.vmem [shape: bf16[9,512], index: 0, kind: input, shape index: {}]   ;;  %s1305_s1 = inlined_call_operand.vmem [shape: bf16[128,9], index: 1, kind: input, shape index: {}]   ;;  %s1306_s2 = inlined_call_operand.vmem [shape: bf16[64,128], index: 2, kind: input, shape index: {}]   ;;  %s1307_s3 = inlined_call_operand.vmem [shape: f32[64,1], index: 3, kind: input, shape index: {}]   ;;  %s1308_s4 = inlined_call_operand.vmem [shape: bf16[8,64], index: 4, kind: input, shape index: {}]   ;;  %s1309_s5 = inlined_call_operand.<no memory space> [shape: f32[1,1], index: 5, kind: input, shape index: {}]   ;;  %s1310_s6 = inlined_call_operand.hbm [shape: f32[1,512], index: 6, kind: output, shape index: {}]  }
   0x1   :  { %v11_v0 = vstv %s1309_s5 }
   0x2   :  { %12 = vst [vmem:[#allocation2] sm:$0x1] %v11_v0 }
   0x3   :  { %13 = vsyncpa [#allocation5], 0 }
   0x4   :  { %15 = vsyncpa [#allocation5 + $0x1], 0  ;;  %s1097_s23 = smov 0   ;;  %s1099_s24 = smov 0  }
   0x5   :  { %s1101_s25 = smov 0   ;;  %s1103_s26 = smov 0  }
   0x6 LB: > { %s894_s5 = sadd.s32 4294967295, %s1053_s26   ;;  %s895_s27 = sadd.s32 4294967294, %s1053_s26   ;;  %s1053_s26 = sphi %s1103_s26, %s1318_s26   ;;  %s1049_s25 = sphi %s1101_s25, %s1317_s25   ;;  %s1045_s24 = sphi %s1099_s24, %s1316_s24   ;;  %s1041_s23 = sphi %s1097_s23, %s1315_s23  }
   0x7   : > { %s1120_s28 = sadd.s32 1, %s1053_s26   ;;  %s28_s29 = sadd.s32 1, %s1049_s25 }
   0x8   : > { %s25_s30 = ssub.s32 %s1053_s26, %s1120_s28  ;;  %p35_p0 = scmp.ne.s32.totalorder %s1049_s25, %s1045_s24 }
   0x9   : > { %p26_p1 = scmp.eq.s32.totalorder %s25_s30, 0  ;;  %p36_p2 = scmp.eq.s32.totalorder %s1053_s26, 0 }
   0xa   : > { %p170_p3 = scmp.eq.s32.totalorder %s894_s5, 1  ;;  %p175_p4 = scmp.ne.s32.totalorder %s1045_s24, %s1041_s23 }
   0xb   : > { %s1133_s7 = scalar_select %p26_p1, %s1049_s25, %s28_s29  }
   0xc   : > { %p37_p5 = por %p36_p2, %p35_p0  ;;  %p1135_p6 = por %p170_p3, %p35_p0 }
   0xd   : > { %p176_p7 = scmp.eq.s32.totalorder %s895_s27, 1  ;;  %p1311_p9 = scmp.ge.s32.totalorder %s1053_s26, 2 }
   0xf   : > { %p1139_p8 = por %p176_p7, %p175_p4  ;;  %207 = sbr.rel (%p1311_p9) target bundleno = 25 (0x19), region = 36 }
  0x14   : > { %210 = sbr.rel (!%p37_p5) target bundleno = 25 (0x19), region = 40  ;;  %s212_s10 = sand.u32 (%p37_p5), 1, %s1049_s25  }
  0x15   : > { %s932_s11 = sshll.u32 (%p37_p5), %s1053_s26, 3  ;;  %s898_s12 = sshll.u32 (%p37_p5), %s212_s10, 4 }
  0x16   : > { %s217_s15 = scalar_lea.vmem (%p37_p5), %s1304_s0, %s932_s11  ;;  %s214_s16 = scalar_lea.vmem (%p37_p5), [#allocation3], %s898_s12 }
  0x17   : > { %v248_v1 = vld [vmem:[%s217_s15] sm:$0xff] (%p37_p5)  ;;  %v250_v2 = vld [vmem:[%s217_s15 + $0x10] sm:$0xff] (%p37_p5) }
  0x18   : > { %249 = vst [vmem:[%s214_s16] sm:$0xff] (%p37_p5), %v248_v1  ;;  %251 = vst [vmem:[%s214_s16 + $0x8] sm:$0xff] (%p37_p5), %v250_v2 }
  0x19 PF: > { %p901_p10 = scmp.ge.s32.totalorder %s1053_s26, 1  ;;  %p256_p11 = scmp.lt.s32.totalorder %s1053_s26, 3 }
  0x1b   : > { %p257_p12 = pnand %p901_p10, %p256_p11 }
  0x1c   : > { %s1154_s17 = sand.u32 (!%p257_p12), 1, %s1045_s24   ;;  %s1058_s10 = smov (!%p257_p12), [#allocation4]  }
  0x1d   : > { %260 = sbr.rel (%p257_p12) target bundleno = 795 (0x31b), region = 78  ;;  %s902_s18 = sshll.u32 (!%p257_p12), %s1154_s17, 4 }
  0x1e   : > { %s265_s19 = scalar_lea.vmem (!%p257_p12), [#allocation3], %s902_s18  ;;  %s903_s16 = sshll.u32 (!%p257_p12), %s1154_s17, 1 }
  0x1f   : > { %s933_s18 = sshll.u32 (!%p257_p12), %s894_s5, 5  ;;  %s816_s29 = scalar_lea.sflag (!%p257_p12), [#allocation5], %s1154_s17 }
  0x20   : > { %s828_s27 = scalar_lea.hbm (!%p257_p12), %s1310_s6, %s933_s18  ;;  %s997_s11 = sshll.u32 (!%p257_p12), %s1058_s10, 4  ;;  %s998_s11 = int_to_ptr.vmem [resolvable:$false] %s997_s11 }
  0x21   : > { %s999_s5 = scalar_lea.vmem (!%p257_p12), %s998_s11, 64 }
  0x22   : > { %vm386_vm0 = vcmask 1043456   ;;  %vm387_vm1 = vcmask 1044480   ;;  %v1055_v3 = vmov 65535   ;;  %v1056_v5 = vmov 0   ;;  %v981_v11 = vld [vmem:[%s1305_s1] sm:$0xff]   ;;  %v982_v12 = vld [vmem:[%s1305_s1 + $0x8] sm:$0xff]  }
  0x23   : > { %v388_v4 = vsel %vm386_vm0, 4294967295, %v1055_v3  ;;  %428 = vmatprep.mubr.bf16.mxu0 %v1056_v5  ;;  %669 = vmatprep.mubr.bf16.mxu1 %v1056_v5  ;;  %v978_v7 = vld [vmem:[%s265_s19 + $0x4] ss:$8 sps:$4 sm:$0x1f]   ;;  %vm361_vm2 = vcmask 72704   ;;  %vm735_vm3 = vcmask 523264  }
  0x24   : > { %v389_v6 = vsel %vm387_vm1, %v388_v4, 0  ;;  %976 = vset.pattern.permute.xlu0 %v1056_v5  ;;  %977 = vset.pattern.permute.xlu1 %v1056_v5  ;;  %v980_v8 = vld [vmem:[%s265_s19] ss:$8 sps:$4 sm:$0x1f]   ;;  %v780_v38 = vld [vmem:[#allocation2] sm:$0x1] }
  0x25   : > { %v394_v9 = vand.u32 %v978_v7, %v389_v6  ;;  %v391_v10 = vand.u32 %v980_v8, %v389_v6  ;;  %v983_v13 = vld [vmem:[%s1305_s1 + $0x10] sm:$0xff]   ;;  %v984_v14 = vld [vmem:[%s1305_s1 + $0x18] sm:$0xff]   ;;  %v985_v15 = vld [vmem:[%s1305_s1 + $0x20] sm:$0xff]   ;;  %s291_s19 = scalar_lea.vmem [#allocation4], %s903_s16 }
  0x26   : > { %v986_v16 = vld [vmem:[%s1305_s1 + $0x28] sm:$0xff]   ;;  %v987_v17 = vld [vmem:[%s1305_s1 + $0x30] sm:$0xff]   ;;  %v988_v18 = vld [vmem:[%s1305_s1 + $0x38] sm:$0xff]   ;;  %s830_s20 = sshll.u32 %s291_s19, 4  ;;  %s831_s20 = int_to_ptr.vmem [resolvable:$true] %s830_s20 }
  0x27   : > { %410 = vmatprep.subr.bf16.mxu0 %v394_v9  ;;  %v571_v19 = vld [vmem:[%s1307_s3 + $0x30] sm:$0xff]  ;;  %v569_v20 = vld [vmem:[%s1307_s3 + $0x20] sm:$0xff]  ;;  %v572_v21 = vld [vmem:[%s1307_s3 + $0x38] sm:$0xff]  ;;  %s993_s30 = scalar_lea.vmem %s831_s20, 32  ;;  %p1000_p2 = scmp.lt.s32.totalorder %s831_s20, %s998_s11 }
  0x28   : > { %411 = vmatpush1.bf16.msra.mxu0 %v391_v10  ;;  %605 = vperm.xlu0 %976, %v571_v19   ;;  %v570_v22 = vld [vmem:[%s1307_s3 + $0x28] sm:$0xff]  ;;  %v567_v24 = vld [vmem:[%s1307_s3 + $0x10] sm:$0xff]  ;;  %v568_v25 = vld [vmem:[%s1307_s3 + $0x18] sm:$0xff]  ;;  %p994_p13 = scmp.ne.s32.totalorder %s831_s20, %s993_s30  ;;  %p1001_p3 = scmp.lt.s32.totalorder %s999_s5, %s993_s30 }
  0x29   : > { %595 = vperm.xlu1 %977, %v569_v20   ;;  %v565_v30 = vld [vmem:[%s1307_s3] sm:$0xff]  ;;  %v566_v31 = vld [vmem:[%s1307_s3 + $0x8] sm:$0xff] }
  0x2a   : > { %p995_p0 = pnand %p994_p13, %p1135_p6  ;;  %p1002_p4 = por %p1001_p3, %p1000_p2 }
  0x2b   : > { %914 = vmatmul.mubr.msk.bf16.vlgmr.msra.gmra.mxu0 %vm361_vm2, %v981_v11 }
  0x2c   : > { %438 = vmatprep.mubr.bf16.mxu0 %v1056_v5  ;;  %610 = vperm.xlu0 %976, %v572_v21   ;;  %p996_p1 = pneg %p995_p0 }
  0x2d   : > { %600 = vperm.xlu1 %977, %v570_v22  }
  0x2e   : > { %p1003_p5 = pnand %p1002_p4, %p996_p1 }
  0x30   : > { %585 = vperm.xlu0 %976, %v567_v24  }
  0x31   : > { %590 = vperm.xlu1 %977, %v568_v25  }
  0x33   : > { %915 = vmatmul.mubr.msk.bf16.gmra.mxu0 %vm361_vm2, %v982_v12 }
  0x34   : > { %448 = vmatprep.mubr.bf16.mxu0 %v1056_v5  ;;  %575 = vperm.xlu0 %976, %v565_v30  }
  0x35   : > { %580 = vperm.xlu1 %977, %v566_v31  }
  0x38   : > { %783 = vperm.xlu0 %976, %v780_v38  }
  0x3b   : > { %916 = vmatmul.mubr.msk.bf16.gmra.mxu0 %vm361_vm2, %v983_v13 }
  0x3c   : > { %458 = vmatprep.mubr.bf16.mxu0 %v1056_v5 }
  0x43   : > { %917 = vmatmul.mubr.msk.bf16.gmra.mxu0 %vm361_vm2, %v984_v14 }
  0x44   : > { %468 = vmatprep.mubr.bf16.mxu0 %v1056_v5 }
  0x4b   : > { %918 = vmatmul.mubr.msk.bf16.gmra.mxu0 %vm361_vm2, %v985_v15 }
  0x4c   : > { %478 = vmatprep.mubr.bf16.mxu0 %v1056_v5 }
  0x53   : > { %919 = vmatmul.mubr.msk.bf16.gmra.mxu0 %vm361_vm2, %v986_v16 }
  0x54   : > { %488 = vmatprep.mubr.bf16.mxu0 %v1056_v5 }
  0x5b   : > { %920 = vmatmul.mubr.msk.bf16.gmra.mxu0 %vm361_vm2, %v987_v17 }
  0x5c   : > { %498 = vmatprep.mubr.bf16.mxu0 %v1056_v5 }
  0x63   : > { %921 = vmatmul.mubr.msk.bf16.gmra.mxu0 %vm361_vm2, %v988_v18 }
  0xeb   : > { %v430_v23 = vpop.f32.mrf.mxu0 }
  0xec   : > { %v509_v28 = vmax.f32 %v430_v23, 0.0 }
  0xed   : > { %v432_v26 = vpop.f32.mrf.mxu0 }
  0xee   : > { %v510_v33 = vmax.f32 %v432_v26, 0.0 }
  0xef   : > { %v434_v27 = vpop.f32.mrf.mxu0 }
  0xf0   : > { %v511_v29 = vmax.f32 %v434_v27, 0.0 }
  0xf1   : > { %v436_v32 = vpop.f32.mrf.mxu0 }
  0xf2   : > { %v1224_v34 = vpack.c.bf16 %v511_v29, %v509_v28  ;;  %v512_v35 = vmax.f32 %v436_v32, 0.0 }
  0xf3   : > { %v440_v36 = vpop.f32.mrf.mxu0 }
  0xf4   : > { %v1226_v37 = vpack.c.bf16 %v512_v35, %v510_v33  ;;  %v513_v41 = vmax.f32 %v440_v36, 0.0 }
  0xf5   : > { %v442_v39 = vpop.f32.mrf.mxu0 }
  0xf6   : > { %v514_v44 = vmax.f32 %v442_v39, 0.0 }
  0xf7   : > { %v444_v40 = vpop.f32.mrf.mxu0 }
  0xf8   : > { %v515_v42 = vmax.f32 %v444_v40, 0.0 }
  0xf9   : > { %v446_v43 = vpop.f32.mrf.mxu0 }
  0xfa   : > { %v1228_v45 = vpack.c.bf16 %v515_v42, %v513_v41  ;;  %v516_v46 = vmax.f32 %v446_v43, 0.0 }
  0xfb   : > { %v1230_v47 = vpop.f32.mrf.mxu0 }
  0xfc   : > { %v1232_v48 = vpack.c.bf16 %v516_v46, %v514_v44  ;;  %v517_v46 = vmax.f32 %v1230_v47, 0.0  ;;  %v990_v47 = vld [vmem:[%s1306_s2 + $0x8] sm:$0xff]  }
  0xfd   : > { %v1234_v49 = vpop.f32.mrf.mxu0 }
  0xfe   : > { %v518_v41 = vmax.f32 %v1234_v49, 0.0  ;;  %v989_v49 = vld [vmem:[%s1306_s2] sm:$0xff]  }
  0xff   : > { %v1236_v50 = vpop.f32.mrf.mxu0 }
 0x100   : > { %v519_v42 = vmax.f32 %v1236_v50, 0.0 }
 0x101   : > { %v1238_v51 = vpop.f32.mrf.mxu0 }
 0x102   : > { %v520_v38 = vmax.f32 %v1238_v51, 0.0 }
 0x103   : > { %v460_v52 = vpop.f32.mrf.mxu0 }
 0x104   : > { %v521_v40 = vmax.f32 %v460_v52, 0.0  ;;  %v546_v44 = vpack.c.bf16 %v520_v38, %v518_v41 }
 0x105   : > { %v462_v53 = vpop.f32.mrf.mxu0 }
 0x106   : > { %v522_v33 = vmax.f32 %v462_v53, 0.0  ;;  %v545_v53 = vpack.c.bf16 %v519_v42, %v517_v46 }
 0x107   : > { %v464_v54 = vpop.f32.mrf.mxu0 }
 0x108   : > { %v523_v35 = vmax.f32 %v464_v54, 0.0 }
 0x109   : > { %v466_v55 = vpop.f32.mrf.mxu0 }
 0x10a   : > { %v524_v30 = vmax.f32 %v466_v55, 0.0  ;;  %v547_v43 = vpack.c.bf16 %v523_v35, %v521_v40 }
 0x10b   : > { %v470_v56 = vpop.f32.mrf.mxu0 }
 0x10c   : > { %v525_v32 = vmax.f32 %v470_v56, 0.0  ;;  %v548_v39 = vpack.c.bf16 %v524_v30, %v522_v33 }
 0x10d   : > { %v472_v57 = vpop.f32.mrf.mxu0 }
 0x10e   : > { %v526_v27 = vmax.f32 %v472_v57, 0.0 }
 0x10f   : > { %v474_v58 = vpop.f32.mrf.mxu0 }
 0x110   : > { %v527_v28 = vmax.f32 %v474_v58, 0.0  ;;  %v596_v58 = vpop.permute.xlu1 %595 }
 0x111   : > { %v476_v59 = vpop.f32.mrf.mxu0 }
 0x112   : > { %v528_v24 = vmax.f32 %v476_v59, 0.0  ;;  %v549_v36 = vpack.c.bf16 %v527_v28, %v525_v32 }
 0x113   : > { %v480_v60 = vpop.f32.mrf.mxu0 }
 0x114   : > { %v529_v26 = vmax.f32 %v480_v60, 0.0  ;;  %v550_v31 = vpack.c.bf16 %v528_v24, %v526_v27  ;;  %v606_v60 = vpop.permute.xlu0 %605 }
 0x115   : > { %v482_v61 = vpop.f32.mrf.mxu0 }
 0x116   : > { %v530_v21 = vmax.f32 %v482_v61, 0.0 }
 0x117   : > { %v484_v62 = vpop.f32.mrf.mxu0 }
 0x118   : > { %v531_v22 = vmax.f32 %v484_v62, 0.0 }
 0x119   : > { %v486_v63 = vpop.f32.mrf.mxu0 }
 0x11a   : > { %v532_v18 = vmax.f32 %v486_v63, 0.0  ;;  %v551_v29 = vpack.c.bf16 %v531_v22, %v529_v26  ;;  %v601_v63 = vpop.permute.xlu1 %600 }
 0x11b   : > { %v490_v0 = vpop.f32.mrf.mxu0 }
 0x11c   : > { %v533_v20 = vmax.f32 %v490_v0, 0.0  ;;  %v552_v25 = vpack.c.bf16 %v532_v18, %v530_v21 }
 0x11d   : > { %v492_v1 = vpop.f32.mrf.mxu0 }
 0x11e   : > { %v534_v14 = vmax.f32 %v492_v1, 0.0  ;;  %v611_v1 = vpop.permute.xlu0 %610 }
 0x11f   : > { %v494_v2 = vpop.f32.mrf.mxu0 }
 0x120   : > { %v535_v16 = vmax.f32 %v494_v2, 0.0 }
 0x121   : > { %v496_v3 = vpop.f32.mrf.mxu0 }
 0x122   : > { %v536_v10 = vmax.f32 %v496_v3, 0.0  ;;  %v553_v23 = vpack.c.bf16 %v535_v16, %v533_v20 }
 0x123   : > { %v500_v4 = vpop.f32.mrf.mxu0 }
 0x124   : > { %v537_v13 = vmax.f32 %v500_v4, 0.0  ;;  %v554_v19 = vpack.c.bf16 %v536_v10, %v534_v14 }
 0x125   : > { %v502_v6 = vpop.f32.mrf.mxu0 }
 0x126   : > { %v538_v11 = vmax.f32 %v502_v6, 0.0 }
 0x127   : > { %v504_v7 = vpop.f32.mrf.mxu0 }
 0x128   : > { %v539_v8 = vmax.f32 %v504_v7, 0.0  ;;  %v591_v7 = vpop.permute.xlu1 %590 }
 0x129   : > { %v506_v9 = vpop.f32.mrf.mxu0 }
 0x12a   : > { %v540_v12 = vmax.f32 %v506_v9, 0.0  ;;  %v555_v17 = vpack.c.bf16 %v539_v8, %v537_v13 }
 0x12c   : > { %v556_v15 = vpack.c.bf16 %v540_v12, %v538_v11  ;;  %v586_v12 = vpop.permute.xlu0 %585  ;;  %v581_v24 = vpop.permute.xlu1 %580 }
 0x12e   : > { %637 = vmatprep.subr.bf16.mxu1 %v556_v15 }
 0x12f   : > { %638 = vmatpush1.bf16.msra.mxu1 %v555_v17 }
 0x130   : > { %639 = vmatprep.subr.bf16.mxu1 %v554_v19 }
 0x133   : > { %640 = vmatpush1.bf16.msra.mxu1 %v553_v23 }
 0x134   : > { %641 = vmatprep.subr.bf16.mxu1 %v552_v25 }
 0x137   : > { %642 = vmatpush1.bf16.msra.mxu1 %v551_v29 }
 0x138   : > { %643 = vmatprep.subr.bf16.mxu1 %v550_v31  ;;  %v576_v31 = vpop.permute.xlu0 %575 }
 0x13b   : > { %644 = vmatpush1.bf16.msra.mxu1 %v549_v36 }
 0x13c   : > { %645 = vmatprep.subr.bf16.mxu1 %v548_v39 }
 0x13f   : > { %646 = vmatpush1.bf16.msra.mxu1 %v547_v43 }
 0x140   : > { %647 = vmatprep.subr.bf16.mxu1 %v546_v44 }
 0x143   : > { %648 = vmatpush1.bf16.msra.mxu1 %v545_v53 }
 0x144   : > { %649 = vmatprep.subr.bf16.mxu1 %v1232_v48 }
 0x147   : > { %650 = vmatpush1.bf16.msra.mxu1 %v1228_v45 }
 0x148   : > { %651 = vmatprep.subr.bf16.mxu1 %v1226_v37  ;;  %v991_v37 = vld [vmem:[%s1306_s2 + $0x10] sm:$0xff]  }
 0x14b   : > { %652 = vmatpush1.bf16.msra.mxu1 %v1224_v34  ;;  %v992_v34 = vld [vmem:[%s1306_s2 + $0x18] sm:$0xff]  }
 0x14e   : > { %670 = vmatmul.mubr.bf16.vlgmr.msra.gmra.mxu1 %v989_v49 }
 0x14f   : > { %679 = vmatprep.mubr.bf16.mxu1 %v1056_v5 }
 0x156   : > { %680 = vmatmul.mubr.bf16.gmra.mxu1 %v990_v47 }
 0x157   : > { %689 = vmatprep.mubr.bf16.mxu1 %v1056_v5 }
 0x15e   : > { %690 = vmatmul.mubr.bf16.gmra.mxu1 %v991_v37 }
 0x15f   : > { %699 = vmatprep.mubr.bf16.mxu1 %v1056_v5 }
 0x166   : > { %700 = vmatmul.mubr.bf16.gmra.mxu1 %v992_v34 }
 0x167   : > { %771 = vmatprep.mubr.bf16.mxu1 %v1056_v5 }
 0x20e   : > { %v671_v45 = vpop.f32.mrf.mxu1 }
 0x20f   : > { %v672_v43 = vadd.f32 %v671_v45, %v576_v31  ;;  %v786_v45 = vlaneseq }
 0x210   : > { %v673_v48 = vpop.f32.mrf.mxu1 }
 0x211   : > { %v674_v35 = vadd.f32 %v673_v48, %v576_v31  ;;  %v710_v37 = vmax.f32 %v672_v43, 0.0  ;;  %v734_v48 = vld [vmem:[%s1308_s4] sm:$0xf]  ;;  %vm812_vm4 = vcmp.lt.s32.totalorder %v786_v45, 256 }
 0x212   : > { %v675_v50 = vpop.f32.mrf.mxu1 }
 0x213   : > { %v676_v38 = vadd.f32 %v675_v50, %v581_v24  ;;  %v711_v46 = vmax.f32 %v674_v35, 0.0  ;;  %v787_v50 = vshrl.u32 %v786_v45, 7 }
 0x214   : > { %v677_v51 = vpop.f32.mrf.mxu1 }
 0x215   : > { %v678_v28 = vadd.f32 %v677_v51, %v581_v24  ;;  %v712_v53 = vmax.f32 %v676_v38, 0.0  ;;  %v1057_v51 = vmov 1966171168  }
 0x216   : > { %v681_v52 = vpop.f32.mrf.mxu1 }
 0x217   : > { %v682_v32 = vadd.f32 %v681_v52, %v586_v12  ;;  %v713_v41 = vmax.f32 %v678_v28, 0.0  ;;  %v726_v34 = vpack.c.bf16 %v712_v53, %v710_v37  ;;  %v796_v52 = vunpack.c.l.s4 %v1057_v51 }
 0x218   : > { %v683_v54 = vpop.f32.mrf.mxu1 }
 0x219   : > { %v684_v21 = vadd.f32 %v683_v54, %v586_v12  ;;  %v714_v44 = vmax.f32 %v682_v32, 0.0  ;;  %v727_v47 = vpack.c.bf16 %v713_v41, %v711_v46  ;;  %v788_v54 = vsub.s32 0, %v787_v50 }
 0x21a   : > { %v685_v55 = vpop.f32.mrf.mxu1 }
 0x21b   : > { %v686_v25 = vadd.f32 %v685_v55, %v591_v7  ;;  %v715_v36 = vmax.f32 %v684_v21, 0.0  ;;  %v784_v55 = vpop.permute.xlu0 %783 }
 0x21c   : > { %v687_v56 = vpop.f32.mrf.mxu1 }
 0x21d   : > { %v688_v15 = vadd.f32 %v687_v56, %v591_v7  ;;  %v716_v39 = vmax.f32 %v686_v25, 0.0  ;;  %v797_v56 = vunpack.c.0.s8 %v796_v52 }
 0x21e   : > { %v691_v57 = vpop.f32.mrf.mxu1 }
 0x21f   : > { %v692_v19 = vadd.f32 %v691_v57, %v596_v58  ;;  %v717_v29 = vmax.f32 %v688_v15, 0.0  ;;  %v728_v49 = vpack.c.bf16 %v716_v39, %v714_v44 }
 0x220   : > { %v693_v59 = vpop.f32.mrf.mxu1 }
 0x221   : > { %v694_v10 = vadd.f32 %v693_v59, %v596_v58  ;;  %v718_v33 = vmax.f32 %v692_v19, 0.0  ;;  %v729_v42 = vpack.c.bf16 %v717_v29, %v715_v36  ;;  %v789_v58 = vrot.slane %v784_v55, %v788_v54 }
 0x222   : > { %v695_v61 = vpop.f32.mrf.mxu1 }
 0x223   : > { %v696_v13 = vadd.f32 %v695_v61, %v601_v63  ;;  %v719_v22 = vmax.f32 %v694_v10, 0.0 }
 0x224   : > { %v697_v62 = vpop.f32.mrf.mxu1 }
 0x225   : > { %v698_v5 = vadd.f32 %v697_v62, %v601_v63  ;;  %v720_v26 = vmax.f32 %v696_v13, 0.0  ;;  %v800_v62 = vsub.s32 %v797_v56, %v787_v50 }
 0x226   : > { %v701_v0 = vpop.f32.mrf.mxu1 }
 0x227   : > { %v702_v8 = vadd.f32 %v701_v0, %v606_v60  ;;  %v721_v16 = vmax.f32 %v698_v5, 0.0  ;;  %v730_v40 = vpack.c.bf16 %v720_v26, %v718_v33 }
 0x228   : > { %v703_v2 = vpop.f32.mrf.mxu1 }
 0x229   : > { %v704_v4 = vadd.f32 %v703_v2, %v606_v60  ;;  %v722_v20 = vmax.f32 %v702_v8, 0.0  ;;  %v731_v30 = vpack.c.bf16 %v721_v16, %v719_v22 }
 0x22a   : > { %v705_v3 = vpop.f32.mrf.mxu1 }
 0x22b   : > { %v706_v6 = vadd.f32 %v705_v3, %v611_v1  ;;  %v723_v17 = vmax.f32 %v704_v4, 0.0 }
 0x22c   : > { %v707_v9 = vpop.f32.mrf.mxu1 }
 0x22d   : > { %v708_v11 = vadd.f32 %v707_v9, %v611_v1  ;;  %v724_v14 = vmax.f32 %v706_v6, 0.0 }
 0x22f   : > { %v725_v18 = vmax.f32 %v708_v11, 0.0  ;;  %v732_v27 = vpack.c.bf16 %v724_v14, %v722_v20 }
 0x231   : > { %v733_v23 = vpack.c.bf16 %v725_v18, %v723_v17 }
 0x233   : > { %747 = vmatprep.subr.bf16.mxu1 %v733_v23 }
 0x234   : > { %748 = vmatpush1.bf16.msra.mxu1 %v732_v27 }
 0x235   : > { %749 = vmatprep.subr.bf16.mxu1 %v731_v30 }
 0x238   : > { %750 = vmatpush1.bf16.msra.mxu1 %v730_v40 }
 0x239   : > { %751 = vmatprep.subr.bf16.mxu1 %v729_v42 }
 0x23c   : > { %752 = vmatpush1.bf16.msra.mxu1 %v728_v49 }
 0x23d   : > { %753 = vmatprep.subr.bf16.mxu1 %v727_v47 }
 0x240   : > { %754 = vmatpush1.bf16.msra.mxu1 %v726_v34 }
 0x243   : > { %926 = vmatmul.mubr.msk.bf16.vlgmr.msra.gmra.mxu1 %vm735_vm3, %v734_v48 }
 0x303   : > { %v773_v57 = vpop.f32.mrf.mxu1 }
 0x304   : > { %v790_v60 = vadd.f32 %v789_v58, %v773_v57 }
 0x305   : > { %v775_v59 = vpop.f32.mrf.mxu1 }
 0x306   : > { %v791_v61 = vadd.f32 %v789_v58, %v775_v59 }
 0x307   : > { %v777_v63 = vpop.f32.mrf.mxu1 }
 0x308   : > { %v794_v0 = vcombine.low %v790_v60, %v791_v61 }
 0x309   : > { %v778_v1 = vpop.f32.mrf.mxu1 }
 0x30a   : > { %v801_v2 = vrot.slane %v794_v0, %v800_v62 }
 0x30c   : > { %v808_v3 = vrot.slane %v801_v2, %v800_v62 }
 0x30e   : > { %814 = vst.msk [vmem:[%s291_s19] sm:$0x3] %vm812_vm4, %v808_v3 }
 0x30f   : > { %1006 = shalt.err (!%p1003_p5)
}
 0x310   : > { %s1007_s12 = scalar_lea.hbm %s828_s27, 32  ;;  %s1011_s14 = scalar_lea.hbm %s1310_s6, 64 }
 0x311   : > { %p1008_p7 = scmp.ne.s32.totalorder %s828_s27, %s1007_s12  ;;  %p1012_p12 = scmp.lt.s32.totalorder %s828_s27, %s1310_s6 }
 0x312   : > { %p1013_p13 = scmp.lt.s32.totalorder %s1011_s14, %s1007_s12 }
 0x313   : > { %p1009_p10 = pnand %p1008_p7, %p1135_p6 }
 0x314   : > { %p1014_p0 = por %p1013_p13, %p1012_p12 }
 0x315   : > { %p1010_p11 = pneg %p1009_p10 }
 0x317   : > { %p1015_p9 = pnand %p1014_p0, %p1010_p11 }
 0x319   : > { %1018 = shalt.err (!%p1015_p9)
}
 0x31a   : > { %934 = dma.vmem_to_hbm [thread:$0]  (%p1135_p6), %s831_s20, 32, %s828_s27, %s816_s29  }
 0x31b PF: > { %s842_s18 = sand.u32 1, %s1041_s23   ;;  %p1314_p1 = scmp.ge.s32.totalorder %s1053_s26, 2 }
 0x31c   : > { %s843_s19 = scalar_lea.sflag [#allocation5], %s842_s18 }
 0x31d   : > { %p937_p2 = pnand %p1314_p1, %p1139_p8 }
 0x31f   : > { %p938_p3 = pneg %p937_p2 }
 0x321   : > { %1036 = dma.done.wait (%p938_p3), %s843_s19, 32  }
 0x322   : > { %1038 = vsyncadd (%p938_p3), %s843_s19, 4294967264  ;;  %p18_p9 = scmp.ge.s32.totalorder %s1120_s28, 4   ;;  %s1315_s23 = smov %s1045_s24 }
 0x323   : > { %s1316_s24 = smov %s1049_s25  ;;  %s1317_s25 = smov %s1133_s7 }
 0x324   : > { %s1318_s26 = smov %s1120_s28  ;;  %20 = sbr.rel (!%p18_p9) target bundleno = 6 (0x6), region = 122 }
 0x329   :  { %848 = vsyncpa [#allocation5], 1 }
 0x32a   :  { %850 = vsyncpa [#allocation5 + $0x1], 1 }

</bundles_post_ra>
